<compile_context>
chip_gen: v6e
topology: v6e:2x2x1
jax: 0.10.0
libtpu: 0.0.40
codegen_flags: <defaults>
</compile_context>

<pallas_src>
import numpy as np
import jax
import jax.numpy as jnp
from jax.experimental import pallas as pl
from jax.experimental.pallas import tpu as pltpu

_LANE = 128
_MAX_TILE_BYTES = 16 * 1024 * 1024   # per input buffer (x2 for double-buffering)
_VMEM_LIMIT = 48 * 1024 * 1024       # <= v7x 64 MiB physical per TC


def _round_up(x: int, m: int) -> int:
    return ((x + m - 1) // m) * m


def _round_down(x: int, m: int) -> int:
    return (x // m) * m


def _make_sum_kernel(n_k: int, tail_rows: int, inv_feat: float):
    """Kernel: per-batch-element streaming sum over (rows, 128) tiles.

    x_ref:   (1, rows_tile, 128) native-dtype input tile.
    o_ref:   (1, 1, 1) f32 output block (written only on the last k step).
    acc_ref: (1, 1, 128) f32 per-lane partial-sum scratch (VMEM resident).
    """

    def kernel(x_ref, o_ref, acc_ref):
        k = pl.program_id(1)

        @pl.when(k == 0)
        def _init():
            acc_ref[...] = jnp.zeros_like(acc_ref)

        def _accum(mask_tail: bool):
            x = x_ref[...].astype(jnp.float32)          # cast on-chip only
            if mask_tail:
                # Ragged last block: rows beyond `tail_rows` are undefined
                # (partial DMA) and MUST be zeroed before the accumulate.
                row = jax.lax.broadcasted_iota(jnp.int32, x.shape, 1)
                x = jnp.where(row < tail_rows, x, 0.0)
            # Sublane-axis reduce: mostly plain vreg adds; lane reduce is
            # deferred to the finalize step.
            acc_ref[...] += jnp.sum(x, axis=1, keepdims=True)

        if tail_rows == 0:
            _accum(False)
        else:
            @pl.when(k < n_k - 1)
            def _full():
                _accum(False)

            @pl.when(k == n_k - 1)
            def _ragged():
                _accum(True)

        @pl.when(k == n_k - 1)
        def _finalize():
            # Single XLU lane-reduce + scale, once per batch element.
            o_ref[...] = jnp.sum(acc_ref[...], axis=-1, keepdims=True) * inv_feat

    return kernel


def brain_age_cnn_forward(imgs: jax.Array) -> jax.Array:
    """imgs: (N, 1, H, W, D)  ->  pred: (N,) float32 (global mean pool)."""
    N = imgs.shape[0]
    feat = int(np.prod(imgs.shape[1:]))
    itemsize = jnp.dtype(imgs.dtype).itemsize
    sub = max(8, 32 // itemsize)          # sublane packing for the native dtype

    rows = feat // _LANE                  # full lane-rows of 128
    rem = feat - rows * _LANE             # lane remainder (< 128)

    if rows == 0:
        # Degenerate tiny input: not worth a kernel launch.
        return jnp.mean(imgs.reshape(N, -1).astype(jnp.float32), axis=-1)

    # Tile sizing: as many rows as fit in ~16 MiB per buffer, multiple of the
    # dtype's sublane packing, never more than the (rounded-up) row count.
    rows_cap = max(sub, _round_down(_MAX_TILE_BYTES // (_LANE * itemsize), sub))
    rows_tile = min(rows_cap, _round_up(rows, sub))
    n_k = -(-rows // rows_tile)
    tail_rows = rows - (n_k - 1) * rows_tile
    if tail_rows == rows_tile:
        tail_rows = 0                     # evenly divides -> no mask path at all
    inv_feat = 1.0 / float(feat)

    x_flat = imgs.reshape(N, feat)        # contiguous -> free, native dtype
    if rem == 0:
        x_main = x_flat.reshape(N, rows, _LANE)          # pure metadata reshape
    else:
        # TODO(synk): feat % 128 != 0 forces one copy of the main slab; this is
        # essentially never hit for real MRI volumes (H*W*D multiple of 128).
        x_main = x_flat[:, : rows * _LANE].reshape(N, rows, _LANE)

    out = pl.pallas_call(
        _make_sum_kernel(n_k, tail_rows, inv_feat),
        out_shape=jax.ShapeDtypeStruct((N, 1, 1), jnp.float32),
        grid_spec=pltpu.PrefetchScalarGridSpec(
            num_scalar_prefetch=0,
            grid=(N, n_k),
            in_specs=[
                pl.BlockSpec((1, rows_tile, _LANE), lambda n, k: (n, k, 0)),
            ],
            out_specs=pl.BlockSpec((1, 1, 1), lambda n, k: (n, 0, 0)),
            scratch_shapes=[pltpu.VMEM((1, 1, _LANE), jnp.float32)],
        ),
        compiler_params=pltpu.CompilerParams(
            dimension_semantics=("parallel", "arbitrary"),
            vmem_limit_bytes=_VMEM_LIMIT,
        ),
        cost_estimate=pl.CostEstimate(
            flops=N * rows * _LANE,
            transcendentals=0,
            bytes_accessed=N * rows * _LANE * itemsize + N * 4,
        ),
    )(x_main)

    pred = out.reshape(N)
    if rem:
        # Tiny tail (< 128 elements per batch element), handled in the wrapper.
        tail = x_flat[:, rows * _LANE:].astype(jnp.float32)
        pred = pred + jnp.sum(tail, axis=-1) * inv_feat
    return pred


if __name__ == "__main__":
    key = jax.random.PRNGKey(0)
    # Small shapes consistent with the module: batch=2, 1 channel, 16^3 volume.
    N, C, H, W, D = 2, 1, 16, 16, 16
    imgs = jax.random.normal(key, (N, C, H, W, D), dtype=jnp.float32)

    pred = jax.block_until_ready(brain_age_cnn_forward(imgs))

    # Sanity check against plain-JAX reference (global mean over non-batch dims).
    ref = jnp.mean(imgs.reshape(N, -1), axis=-1)
    assert pred.shape == (N,)
    np.testing.assert_allclose(np.asarray(pred), np.asarray(ref), rtol=1e-5, atol=1e-5)

    print("KERNEL_OK")
</pallas_src>

<mosaic_0001>
module attributes {stable_mosaic.version = 11 : i64} {
  func.func @kernel(%arg0: i32, %arg1: i32, %arg2: memref<1x32x128xf32, #tpu.memory_space<vmem>>, %arg3: memref<1x1x1xf32, #tpu.memory_space<vmem>>, %arg4: memref<1x1x128xf32, #tpu.memory_space<vmem>>) attributes {dimension_semantics = [#tpu.dimension_semantics<parallel>, #tpu.dimension_semantics<arbitrary>], iteration_bounds = array<i64: 2, 1>, scalar_prefetch = 0 : i64, scratch_operands = 1 : i64, tpu.core_type = #tpu.core_type<tc>, window_params = [{transform_indices = @transform_0, window_bounds = array<i64: 1, 32, 128>}, {transform_indices = @transform_1, window_bounds = array<i64: 1, 1, 1>}]} {
    %c0_i32 = arith.constant 0 : i32
    %0 = arith.cmpi eq, %arg1, %c0_i32 : i32
    %1 = arith.extui %0 : i1 to i32
    %c0_i32_0 = arith.constant 0 : i32
    %2 = arith.cmpi ne, %1, %c0_i32_0 : i32
    scf.if %2 {
      %cst_11 = arith.constant 0.000000e+00 : f32
      %12 = vector.broadcast %cst_11 : f32 to vector<1x1x128xf32>
      %c0_12 = arith.constant 0 : index
      %c0_13 = arith.constant 0 : index
      %c0_14 = arith.constant 0 : index
      %13 = vector.load %arg4[%c0_12, %c0_13, %c0_14] : memref<1x1x128xf32, #tpu.memory_space<vmem>>, vector<1x1x128xf32>
      tpu.vector_store %arg4[%c0_12, %c0_13, %c0_14], %12 {strides = array<i32>} : memref<1x1x128xf32, #tpu.memory_space<vmem>>, vector<1x1x128xf32>,
    } else {
    }
    %c0 = arith.constant 0 : index
    %c0_1 = arith.constant 0 : index
    %c0_2 = arith.constant 0 : index
    %3 = vector.load %arg2[%c0, %c0_1, %c0_2] : memref<1x32x128xf32, #tpu.memory_space<vmem>>, vector<1x32x128xf32>
    %c0_3 = arith.constant 0 : index
    %c0_4 = arith.constant 0 : index
    %c0_5 = arith.constant 0 : index
    %4 = vector.load %arg4[%c0_3, %c0_4, %c0_5] : memref<1x1x128xf32, #tpu.memory_space<vmem>>, vector<1x1x128xf32>
    %cst = arith.constant dense<0.000000e+00> : vector<1x128xf32>
    %5 = vector.multi_reduction <add>, %3, %cst [1] : vector<1x32x128xf32> to vector<1x128xf32>
    %6 = vector.shape_cast %5 : vector<1x128xf32> to vector<1x1x128xf32>
    %7 = arith.addf %4, %6 : vector<1x1x128xf32>
    %c0_6 = arith.constant 0 : index
    %c0_7 = arith.constant 0 : index
    %c0_8 = arith.constant 0 : index
    %8 = vector.load %arg4[%c0_6, %c0_7, %c0_8] : memref<1x1x128xf32, #tpu.memory_space<vmem>>, vector<1x1x128xf32>
    tpu.vector_store %arg4[%c0_6, %c0_7, %c0_8], %7 {strides = array<i32>} : memref<1x1x128xf32, #tpu.memory_space<vmem>>, vector<1x1x128xf32>,
    %c0_i32_9 = arith.constant 0 : i32
    %9 = arith.cmpi eq, %arg1, %c0_i32_9 : i32
    %10 = arith.extui %9 : i1 to i32
    %c0_i32_10 = arith.constant 0 : i32
    %11 = arith.cmpi ne, %10, %c0_i32_10 : i32
    scf.if %11 {
      %c0_11 = arith.constant 0 : index
      %c0_12 = arith.constant 0 : index
      %c0_13 = arith.constant 0 : index
      %12 = vector.load %arg4[%c0_11, %c0_12, %c0_13] : memref<1x1x128xf32, #tpu.memory_space<vmem>>, vector<1x1x128xf32>
      %cst_14 = arith.constant dense<0.000000e+00> : vector<1x1xf32>
      %13 = vector.multi_reduction <add>, %12, %cst_14 [2] : vector<1x1x128xf32> to vector<1x1xf32>
      %14 = vector.shape_cast %13 : vector<1x1xf32> to vector<1x1x1xf32>
      %cst_15 = arith.constant 2.44140625E-4 : f32
      %15 = vector.broadcast %cst_15 : f32 to vector<1x1x1xf32>
      %16 = arith.mulf %14, %15 : vector<1x1x1xf32>
      %c0_16 = arith.constant 0 : index
      %c0_17 = arith.constant 0 : index
      %c0_18 = arith.constant 0 : index
      %17 = vector.load %arg3[%c0_16, %c0_17, %c0_18] : memref<1x1x1xf32, #tpu.memory_space<vmem>>, vector<1x1x1xf32>
      tpu.vector_store %arg3[%c0_16, %c0_17, %c0_18], %16 {strides = array<i32>} : memref<1x1x1xf32, #tpu.memory_space<vmem>>, vector<1x1x1xf32>,
    } else {
    }
    return
  }
  func.func @transform_0(%arg0: i32, %arg1: i32) -> (i32, i32, i32) {
    %c0_i32 = arith.constant 0 : i32
    %c0_i32_0 = arith.constant 0 : i32
    return %arg0, %arg1, %c0_i32 : i32, i32, i32
  }
  func.func @transform_1(%arg0: i32, %arg1: i32) -> (i32, i32, i32) {
    %c0_i32 = arith.constant 0 : i32
    %c0_i32_0 = arith.constant 0 : i32
    %c0_i32_1 = arith.constant 0 : i32
    return %arg0, %c0_i32, %c0_i32_0 : i32, i32, i32
  }
}

</mosaic_0001>

<bundles_post_ra>
// kernel: tpu_custom_call.1
= control target key start
LH: loop header
LB: loop body
LE: loop exit
PB: predicated region body
PF: predicated region fallthrough
CT: control target
= control target key end

     0   :  { %6 = vsyncpa [#allocation4], 0  ;;  %s512_s0 = inlined_call_operand.hbm [shape: f32[2,32,128], index: 0, kind: input, shape index: {}]   ;;  %s513_s1 = inlined_call_operand.vmem [shape: f32[2,1,1], index: 1, kind: output, shape index: {}]  }
   0x1   :  { %8 = vsyncpa [#allocation4 + $0x1], 0  ;;  %s416_s6 = smov 0   ;;  %s418_s7 = smov 0  }
   0x2   :  { %s420_s8 = smov 0   ;;  %s422_s9 = smov 0  }
   0x3   :  { %s424_s10 = smov 0   ;;  %s426_s11 = smov 0  }
   0x4 LB: > { %s252_s12 = sadd.s32 4294967295, %s400_s11   ;;  %s26_s13 = sadd.s32 1, %s396_s10  ;;  %s400_s11 = sphi %s426_s11, %s14_s11   ;;  %s396_s10 = sphi %s424_s10, %s521_s10   ;;  %s392_s9 = sphi %s422_s9, %s520_s9   ;;  %s388_s8 = sphi %s420_s8, %s519_s8   ;;  %s384_s7 = sphi %s418_s7, %s518_s7   ;;  %s380_s6 = sphi %s416_s6, %s517_s6  }
   0x5   : > { %p28_p0 = scmp.ge.s32.totalorder %s26_s13, 2  ;;  %s35_s14 = sadd.s32 1, %s388_s8 }
   0x6   : > { %p42_p1 = scmp.ne.s32.totalorder %s388_s8, %s384_s7  ;;  %p43_p2 = scmp.eq.s32.totalorder %s400_s11, 0 }
   0x7   : > { %s523_s13 = smov (%p28_p0, %s26_s13), 0  ;;  %p48_p4 = scmp.ne.s32.totalorder %s384_s7, %s380_s6 }
   0x8   : > { %p452_p3 = por %p43_p2, %p42_p1  ;;  %s30_s16 = ssub.s32 %s396_s10, %s523_s13 }
   0x9   : > { %p49_p5 = scmp.eq.s32.totalorder %s252_s12, 0  ;;  %p33_p6 = scmp.eq.s32.totalorder %s30_s16, 0 }
   0xa   : > { %p270_p8 = scmp.lt.s32.totalorder %s400_s11, 2  ;;  %s98_s19 = sand.u32 1, %s388_s8  }
   0xb   : > { %p459_p7 = por %p49_p5, %p48_p4  ;;  %s263_s20 = sshll.u32 %s396_s10, 9 }
   0xc   : > { %s465_s18 = scalar_select %p33_p6, %s388_s8, %s35_s14  }
   0xd   : > { %s256_s21 = sshll.u32 %s98_s19, 5  ;;  %s110_s24 = scalar_lea.hbm %s512_s0, %s263_s20 }
   0xe   : > { %s102_s25 = scalar_lea.vmem [#allocation3], %s256_s21  ;;  %p474_p9 = pnand %p270_p8, %p452_p3 }
   0xf   : > { %s111_s26 = sshll.u32 %s102_s25, 4  ;;  %s99_s28 = scalar_lea.sflag [#allocation4], %s98_s19  ;;  %s112_s26 = int_to_ptr.vmem [resolvable:$true] %s111_s26 }
  0x10   : > { %p324_p10 = pneg %p474_p9  ;;  %s335_s29 = scalar_lea.vmem %s112_s26, 512 }
  0x11   : > { %p336_p11 = scmp.ne.s32.totalorder %s112_s26, %s335_s29  ;;  %s402_s30 = smov [#allocation3]  }
  0x12   : > { %s340_s2 = sshll.u32 %s402_s30, 4  ;;  %s341_s2 = int_to_ptr.vmem [resolvable:$false] %s340_s2 }
  0x13   : > { %p338_p12 = pnand %p336_p11, %p324_p10  ;;  %s342_s3 = scalar_lea.vmem %s341_s2, 1024 }
  0x14   : > { %p343_p0 = scmp.lt.s32.totalorder %s112_s26, %s341_s2  ;;  %p344_p1 = scmp.lt.s32.totalorder %s342_s3, %s335_s29 }
  0x15   : > { %p339_p13 = pneg %p338_p12 }
  0x16   : > { %p345_p2 = por %p344_p1, %p343_p0 }
  0x18   : > { %p346_p3 = pnand %p345_p2, %p339_p13 }
  0x1a   : > { %349 = shalt.err (!%p346_p3)
}
  0x1b   : > { %s403_s4 = smov 128   ;;  %s404_s5 = smov 8  }
  0x1c   : > { %269 = dma.hbm_to_vmem [thread:$0]  (!%p474_p9), %s110_s24, 512, %s112_s26, %s99_s28, %s403_s4, %s403_s4, %s404_s5  }
  0x1d   : > { %p259_p4 = scmp.ge.s32.totalorder %s400_s11, 1  ;;  %p119_p5 = scmp.lt.s32.totalorder %s400_s11, 3 }
  0x1f   : > { %p120_p6 = pnand %p259_p4, %p119_p5 }
  0x20   : > { %s125_s6 = sand.u32 (!%p120_p6), 1, %s384_s7  }
  0x21   : > { %123 = sbr.rel (%p120_p6) target bundleno = 210 (0xd2), region = 24  ;;  %s260_s12 = sshll.u32 (!%p120_p6), %s125_s6, 5 }
  0x22   : > { %s126_s14 = scalar_lea.sflag (!%p120_p6), [#allocation4], %s125_s6  ;;  %s129_s15 = scalar_lea.vmem (!%p120_p6), [#allocation3], %s260_s12 }
  0x26   : > { %375 = dma.done.wait (%p459_p7), %s126_s14, 512  }
  0x27   : > { %377 = vsyncadd (%p459_p7), %s126_s14, 4294966784  ;;  %v405_v0 = vmov 0.0   ;;  %v155_v1 = vld [vmem:[%s129_s15] sm:$0xff]  ;;  %v156_v2 = vld [vmem:[%s129_s15 + $0x8] sm:$0xff]  ;;  %vm175_vm0 = vcmask 1040384   ;;  %p147_p7 = scmp.lt.s32.totalorder %s392_s9, 1 }
  0x28   : > { %154 = vst [vmem:[#allocation2] sm:$0x1] %v405_v0  ;;  %v157_v3 = vld [vmem:[%s129_s15 + $0x10] sm:$0xff]  ;;  %v160_v4 = vadd.f32 %v156_v2, %v155_v1  ;;  %v158_v5 = vld [vmem:[%s129_s15 + $0x18] sm:$0xff]  ;;  %vm180_vm1 = vcmask 0  }
  0x29   : > { %s525_s9 = smov (!%p147_p7, %s392_s9), 1 }
  0x2a   : > { %v161_v6 = vadd.f32 %v160_v4, %v157_v3  ;;  %s149_s19 = scalar_lea.vmem %s513_s1, %s525_s9 }
  0x2c   : > { %v162_v7 = vadd.f32 %v161_v6, %v158_v5 }
  0x2e   : > { %v163_v8 = vrot.slane %v162_v7, 4 }
  0x2f   : > { %v159_v13 = vld [vmem:[#allocation2] sm:$0x1] }
  0x30   : > { %v164_v9 = vadd.f32 %v163_v8, %v162_v7 }
  0x32   : > { %v165_v10 = vrot.slane %v164_v9, 2 }
  0x34   : > { %v166_v11 = vadd.f32 %v165_v10, %v164_v9 }
  0x36   : > { %v167_v12 = vrot.slane %v166_v11, 1 }
  0x38   : > { %v168_v14 = vadd.f32 %v167_v12, %v166_v11 }
  0x3a   : > { %v169_v15 = vadd.f32 %v168_v14, %v159_v13 }
  0x3c   : > { %170 = vst [vmem:[#allocation2] sm:$0x1] %v169_v15 }
  0x43   : > { %v174_v16 = vld [vmem:[#allocation2] sm:$0x1] }
  0x44   : > { %v176_v17 = vsel %vm175_vm0, %v174_v16, 0.0 }
  0x45   : > { %177 = vadd.xlane.f32.xlu0 %v176_v17 }
  0xce   : > { %v178_v18 = vpop.xlane.xlu0 %177 }
  0xcf   : > { %v179_v19 = vmul.f32 0.00024414063, %v178_v18 }
  0xd1   : > { %181 = vst.msk [vmem:[%s149_s19] sm:$0x1] %vm180_vm1, %v179_v19 }
  0xd2 PF: > { %s14_s11 = sadd.s32 1, %s400_s11   ;;  %s517_s6 = smov %s384_s7 }
  0xd3   : > { %p11_p8 = scmp.ge.s32.totalorder %s14_s11, 4   ;;  %s518_s7 = smov %s388_s8 }
  0xd4   : > { %s519_s8 = smov %s465_s18  ;;  %s520_s9 = smov %s396_s10 }
  0xd5   : > { %s521_s10 = smov %s523_s13  ;;  %13 = sbr.rel (!%p11_p8) target bundleno = 4 (0x4), region = 72 }
  0xda   :  { %199 = vsyncpa [#allocation4], 1 }
  0xdb   :  { %201 = vsyncpa [#allocation4 + $0x1], 1 }

</bundles_post_ra>
